<compile_context>
chip_gen: v7x
topology: tpu7x:2x2x1
jax: 0.10.0
libtpu: 0.0.40
codegen_flags: <defaults>
</compile_context>

<pallas_src>
import functools

import jax
import jax.numpy as jnp
from jax.experimental import pallas as pl
from jax.experimental.pallas import tpu as pltpu

COS_EPS = 1e-8           # torch.nn.functional.cosine_similarity default eps
MIB = 1024 * 1024
LANE_ROW_BYTES = 128 * 4  # one lane-padded f32 row of a (tile_b, 1) block


def _contrastive_cos_kernel(s_ref, t_ref, l_ref, o_ref, acc_ref, *, margin):
    i = pl.program_id(1)  # reduction axis: batch tiles owned by this core

    @pl.when(i == 0)
    def _():
        acc_ref[...] = jnp.zeros_like(acc_ref)

    s = s_ref[...].astype(jnp.float32)            # (tile_b, D)
    t = t_ref[...].astype(jnp.float32)            # (tile_b, D)
    lbl = l_ref[...].astype(jnp.float32)          # (tile_b, 1)

    # torch cosine_similarity(dim=1) clamps each norm separately:
    #   cos = (x / max(||x||, eps)) . (y / max(||y||, eps))
    w12 = jnp.sum(s * t, axis=-1, keepdims=True)  # (tile_b, 1)
    w1 = jnp.sum(s * s, axis=-1, keepdims=True)
    w2 = jnp.sum(t * t, axis=-1, keepdims=True)
    inv1 = jax.lax.rsqrt(jnp.maximum(w1, COS_EPS * COS_EPS))   # EUP
    inv2 = jax.lax.rsqrt(jnp.maximum(w2, COS_EPS * COS_EPS))   # EUP
    cos = w12 * inv1 * inv2

    nd = 1.0 - cos                                # new_distance
    bound_neg = jnp.maximum(margin * margin - nd, 0.0)
    loss = lbl * nd * nd + (1.0 - lbl) * bound_neg * bound_neg  # (tile_b, 1)

    # Per-row vector accumulator: pure VPU adds per step; the cross-sublane
    # reduction happens exactly once, in the finalize block below.
    acc_ref[...] += loss

    @pl.when(i == pl.num_programs(1) - 1)
    def _():
        partial = jnp.sum(acc_ref[...], keepdims=True)          # (1, 1)
        o_ref[...] = jnp.broadcast_to(partial, o_ref.shape)      # (8, 128)


def _vmem_capacity_bytes():
    """Per-TensorCore VMEM capacity; conservative fallback if unknown."""
    try:
        return int(pltpu.get_tpu_info().vmem_capacity_bytes)
    except Exception:
        return 64 * MIB  # v7x-sized fallback: safe everywhere


def contrastive_loss(student, teacher, label, *, margin=20.0,
                     max_tile_b=131072):
    """Scalar mean contrastive (cosine) loss, matching the PyTorch forward."""
    B, D = student.shape
    assert teacher.shape == (B, D)
    # Do NOT upcast the big inputs here: the kernel casts to f32 in VMEM, so a
    # bf16 caller keeps the HBM streams half-width (this op is BW-bound).
    label2d = jnp.asarray(label, jnp.float32).reshape(B, 1)

    # ---- generation-aware VMEM budget -------------------------------------
    vmem_cap = _vmem_capacity_bytes()
    if vmem_cap >= 100 * MIB:          # v5e / v6e: 128 MiB per TensorCore
        tile_budget = 88 * MIB         # total tile footprint (double-buffered)
        vmem_limit = 110 * MIB
        likely_two_cores = False       # single TC per chip
    else:                              # v7x (64 MiB per TC) or unknown
        tile_budget = 36 * MIB
        vmem_limit = 48 * MIB
        likely_two_cores = True        # v7x has 2 TCs per chip

    # ---- tile sizing with *padded* VMEM shapes ----------------------------
    itemsize = jnp.dtype(student.dtype).itemsize
    d_pad = -(-D // 128) * 128         # lane padding of the feature dim
    # double-buffered (student + teacher + label) blocks + single acc scratch
    per_row_vmem = 2 * (2 * d_pad * itemsize + LANE_ROW_BYTES) + LANE_ROW_BYTES
    budget_rows = max(8, int(tile_budget // per_row_vmem))
    if 8 * per_row_vmem > tile_budget:
        # TODO(synk): add a D-tiling path (grid axis over D with partial
        # w12/w1/w2 accumulators) for very large D on v7x's 64 MiB VMEM.
        pass
    tile_cap = max(8, (min(int(max_tile_b), budget_rows) // 8) * 8)

    if B <= tile_cap:
        tile_b = B                     # single full-array block
        n_tiles = 1
        pad_rows = 0
    else:
        tile_b = tile_cap              # multiple of 8
        n_tiles = -(-B // tile_b)      # ceil div
        if likely_two_cores and n_tiles >= 2 and (n_tiles % 2 == 1):
            n_tiles += 1               # one extra fully-padded tile -> even split
        pad_rows = n_tiles * tile_b - B

    if pad_rows:
        # Padded rows: student = teacher = ones, label = 1  =>  cos = 1,
        # new_distance = 0, loss = label * 0**2 = 0 (up to ~1e-14 rounding),
        # so no per-step mask is needed inside the kernel.
        student = jnp.pad(student, ((0, pad_rows), (0, 0)), constant_values=1)
        teacher = jnp.pad(teacher, ((0, pad_rows), (0, 0)), constant_values=1)
        label2d = jnp.pad(label2d, ((0, pad_rows), (0, 0)), constant_values=1.0)

    # 2-way split of the reduction only on dual-TensorCore chips (v7x); on
    # single-TC chips the leading axis collapses to 1 (no extra epilogue).
    n_par = 2 if (likely_two_cores and n_tiles >= 2) else 1
    tiles_per_par = n_tiles // n_par

    kernel = functools.partial(_contrastive_cos_kernel, margin=float(margin))

    cost = pl.CostEstimate(
        flops=6 * B * D,               # 3 muls + 3 adds per element
        transcendentals=2 * B,         # two rsqrts per row
        bytes_accessed=B * (2 * D * itemsize + 4) + n_par * 8 * 128 * 4,
    )

    partials = pl.pallas_call(
        kernel,
        out_shape=jax.ShapeDtypeStruct((n_par * 8, 128), jnp.float32),
        grid_spec=pltpu.PrefetchScalarGridSpec(
            num_scalar_prefetch=0,
            grid=(n_par, tiles_per_par),
            in_specs=[
                pl.BlockSpec((tile_b, D),
                             lambda p, i: (p * tiles_per_par + i, 0)),
                pl.BlockSpec((tile_b, D),
                             lambda p, i: (p * tiles_per_par + i, 0)),
                pl.BlockSpec((tile_b, 1),
                             lambda p, i: (p * tiles_per_par + i, 0)),
            ],
            out_specs=pl.BlockSpec((8, 128), lambda p, i: (p, 0)),
            scratch_shapes=[pltpu.VMEM((tile_b, 1), jnp.float32)],
        ),
        compiler_params=pltpu.CompilerParams(
            dimension_semantics=("parallel", "arbitrary"),
            vmem_limit_bytes=int(vmem_limit),
        ),
        cost_estimate=cost,
    )(student, teacher, label2d)

    # Each (8, 128) block holds its core's partial sum broadcast everywhere;
    # pick one representative element per block and combine.
    per_core = partials[::8, 0]                     # (n_par,)
    return jnp.sum(per_core) / jnp.float32(B)


def _reference(student, teacher, label, margin=20.0):
    s = student.astype(jnp.float32)
    t = teacher.astype(jnp.float32)
    w12 = jnp.sum(s * t, axis=1)
    n1 = jnp.maximum(jnp.sqrt(jnp.sum(s * s, axis=1)), COS_EPS)
    n2 = jnp.maximum(jnp.sqrt(jnp.sum(t * t, axis=1)), COS_EPS)
    cos = w12 / (n1 * n2)
    nd = 1.0 - cos
    bound = jnp.maximum(margin ** 2 - nd, 0.0) ** 2
    loss = label.astype(jnp.float32) * nd ** 2 + (1.0 - label) * bound
    return loss.mean()


if __name__ == "__main__":
    key = jax.random.PRNGKey(0)
    k1, k2, k3 = jax.random.split(key, 3)

    B, D = 16, 32
    student = jax.random.normal(k1, (B, D), dtype=jnp.float32)
    teacher = jax.random.normal(k2, (B, D), dtype=jnp.float32)
    label = jax.random.bernoulli(k3, 0.5, (B,)).astype(jnp.float32)

    loss = contrastive_loss(student, teacher, label)   # margin=20.0 (ctor default)
    jax.block_until_ready(loss)

    ref = _reference(student, teacher, label)
    assert jnp.allclose(loss, ref, rtol=1e-5, atol=1e-3), (loss, ref)
    print("KERNEL_OK")
</pallas_src>

<mosaic_0001>
module attributes {stable_mosaic.version = 11 : i64} {
  func.func @_contrastive_cos_kernel(%arg0: i32, %arg1: i32, %arg2: memref<16x32xf32, #tpu.memory_space<vmem>>, %arg3: memref<16x32xf32, #tpu.memory_space<vmem>>, %arg4: memref<16x1xf32, #tpu.memory_space<vmem>>, %arg5: memref<8x128xf32, #tpu.memory_space<vmem>>, %arg6: memref<16x1xf32, #tpu.memory_space<vmem>>) attributes {dimension_semantics = [#tpu.dimension_semantics<parallel>, #tpu.dimension_semantics<arbitrary>], iteration_bounds = array<i64: 1, 1>, scalar_prefetch = 0 : i64, scratch_operands = 1 : i64, tpu.core_type = #tpu.core_type<tc>, window_params = [{transform_indices = @transform_0, window_bounds = array<i64: 16, 32>}, {transform_indices = @transform_1, window_bounds = array<i64: 16, 32>}, {transform_indices = @transform_2, window_bounds = array<i64: 16, 1>}, {transform_indices = @transform_3, window_bounds = array<i64: 8, 128>}]} {
    %c0_i32 = arith.constant 0 : i32
    %0 = arith.cmpi eq, %arg1, %c0_i32 : i32
    %1 = arith.extui %0 : i1 to i32
    %c0_i32_0 = arith.constant 0 : i32
    %2 = arith.cmpi ne, %1, %c0_i32_0 : i32
    scf.if %2 {
      %cst_20 = arith.constant 0.000000e+00 : f32
      %42 = vector.broadcast %cst_20 : f32 to vector<16x1xf32>
      %c0_21 = arith.constant 0 : index
      %c0_22 = arith.constant 0 : index
      %43 = vector.load %arg6[%c0_21, %c0_22] : memref<16x1xf32, #tpu.memory_space<vmem>>, vector<16x1xf32>
      tpu.vector_store %arg6[%c0_21, %c0_22], %42 {strides = array<i32>} : memref<16x1xf32, #tpu.memory_space<vmem>>, vector<16x1xf32>,
    } else {
    }
    %c0 = arith.constant 0 : index
    %c0_1 = arith.constant 0 : index
    %3 = vector.load %arg2[%c0, %c0_1] : memref<16x32xf32, #tpu.memory_space<vmem>>, vector<16x32xf32>
    %c0_2 = arith.constant 0 : index
    %c0_3 = arith.constant 0 : index
    %4 = vector.load %arg3[%c0_2, %c0_3] : memref<16x32xf32, #tpu.memory_space<vmem>>, vector<16x32xf32>
    %c0_4 = arith.constant 0 : index
    %c0_5 = arith.constant 0 : index
    %5 = vector.load %arg4[%c0_4, %c0_5] : memref<16x1xf32, #tpu.memory_space<vmem>>, vector<16x1xf32>
    %6 = arith.mulf %3, %4 : vector<16x32xf32>
    %cst = arith.constant dense<0.000000e+00> : vector<16xf32>
    %7 = vector.multi_reduction <add>, %6, %cst [1] : vector<16x32xf32> to vector<16xf32>
    %8 = vector.shape_cast %7 : vector<16xf32> to vector<16x1xf32>
    %9 = arith.mulf %3, %3 : vector<16x32xf32>
    %cst_6 = arith.constant dense<0.000000e+00> : vector<16xf32>
    %10 = vector.multi_reduction <add>, %9, %cst_6 [1] : vector<16x32xf32> to vector<16xf32>
    %11 = vector.shape_cast %10 : vector<16xf32> to vector<16x1xf32>
    %12 = arith.mulf %4, %4 : vector<16x32xf32>
    %cst_7 = arith.constant dense<0.000000e+00> : vector<16xf32>
    %13 = vector.multi_reduction <add>, %12, %cst_7 [1] : vector<16x32xf32> to vector<16xf32>
    %14 = vector.shape_cast %13 : vector<16xf32> to vector<16x1xf32>
    %cst_8 = arith.constant 1.000000e-16 : f32
    %15 = vector.broadcast %cst_8 : f32 to vector<16x1xf32>
    %16 = arith.maximumf %11, %15 : vector<16x1xf32>
    %17 = math.rsqrt %16 : vector<16x1xf32>
    %cst_9 = arith.constant 1.000000e-16 : f32
    %18 = vector.broadcast %cst_9 : f32 to vector<16x1xf32>
    %19 = arith.maximumf %14, %18 : vector<16x1xf32>
    %20 = math.rsqrt %19 : vector<16x1xf32>
    %21 = arith.mulf %8, %17 : vector<16x1xf32>
    %22 = arith.mulf %21, %20 : vector<16x1xf32>
    %cst_10 = arith.constant 1.000000e+00 : f32
    %23 = vector.broadcast %cst_10 : f32 to vector<16x1xf32>
    %24 = arith.subf %23, %22 : vector<16x1xf32>
    %cst_11 = arith.constant 4.000000e+02 : f32
    %25 = vector.broadcast %cst_11 : f32 to vector<16x1xf32>
    %26 = arith.subf %25, %24 : vector<16x1xf32>
    %cst_12 = arith.constant 0.000000e+00 : f32
    %27 = vector.broadcast %cst_12 : f32 to vector<16x1xf32>
    %28 = arith.maximumf %26, %27 : vector<16x1xf32>
    %29 = arith.mulf %5, %24 : vector<16x1xf32>
    %30 = arith.mulf %29, %24 : vector<16x1xf32>
    %cst_13 = arith.constant 1.000000e+00 : f32
    %31 = vector.broadcast %cst_13 : f32 to vector<16x1xf32>
    %32 = arith.subf %31, %5 : vector<16x1xf32>
    %33 = arith.mulf %32, %28 : vector<16x1xf32>
    %34 = arith.mulf %33, %28 : vector<16x1xf32>
    %35 = arith.addf %30, %34 : vector<16x1xf32>
    %c0_14 = arith.constant 0 : index
    %c0_15 = arith.constant 0 : index
    %36 = vector.load %arg6[%c0_14, %c0_15] : memref<16x1xf32, #tpu.memory_space<vmem>>, vector<16x1xf32>
    %37 = arith.addf %36, %35 : vector<16x1xf32>
    %c0_16 = arith.constant 0 : index
    %c0_17 = arith.constant 0 : index
    %38 = vector.load %arg6[%c0_16, %c0_17] : memref<16x1xf32, #tpu.memory_space<vmem>>, vector<16x1xf32>
    tpu.vector_store %arg6[%c0_16, %c0_17], %37 {strides = array<i32>} : memref<16x1xf32, #tpu.memory_space<vmem>>, vector<16x1xf32>,
    %c0_i32_18 = arith.constant 0 : i32
    %39 = arith.cmpi eq, %arg1, %c0_i32_18 : i32
    %40 = arith.extui %39 : i1 to i32
    %c0_i32_19 = arith.constant 0 : i32
    %41 = arith.cmpi ne, %40, %c0_i32_19 : i32
    scf.if %41 {
      %c0_20 = arith.constant 0 : index
      %c0_21 = arith.constant 0 : index
      %42 = vector.load %arg6[%c0_20, %c0_21] : memref<16x1xf32, #tpu.memory_space<vmem>>, vector<16x1xf32>
      %43 = vector.shape_cast %42 : vector<16x1xf32> to vector<1x16x1xf32>
      %cst_22 = arith.constant dense<0.000000e+00> : vector<1xf32>
      %44 = vector.multi_reduction <add>, %43, %cst_22 [1, 2] : vector<1x16x1xf32> to vector<1xf32>
      %45 = vector.shape_cast %44 : vector<1xf32> to vector<1x1x1xf32>
      %46 = vector.extract %45[0, 0, 0] : f32 from vector<1x1x1xf32>
      %47 = vector.broadcast %46 : f32 to vector<1x1xf32>
      %48 = vector.shape_cast %47 : vector<1x1xf32> to vector<1x1xf32>
      %49 = vector.broadcast %48 : vector<1x1xf32> to vector<8x128xf32>
      %c0_23 = arith.constant 0 : index
      %c0_24 = arith.constant 0 : index
      %50 = vector.load %arg5[%c0_23, %c0_24] : memref<8x128xf32, #tpu.memory_space<vmem>>, vector<8x128xf32>
      tpu.vector_store %arg5[%c0_23, %c0_24], %49 {strides = array<i32>} : memref<8x128xf32, #tpu.memory_space<vmem>>, vector<8x128xf32>,
    } else {
    }
    return
  }
  func.func @transform_0(%arg0: i32, %arg1: i32) -> (i32, i32) {
    %c1_i32 = arith.constant 1 : i32
    %0 = arith.muli %arg0, %c1_i32 : i32
    %1 = arith.addi %0, %arg1 : i32
    %c0_i32 = arith.constant 0 : i32
    %c0_i32_0 = arith.constant 0 : i32
    return %1, %c0_i32 : i32, i32
  }
  func.func @transform_1(%arg0: i32, %arg1: i32) -> (i32, i32) {
    %c1_i32 = arith.constant 1 : i32
    %0 = arith.muli %arg0, %c1_i32 : i32
    %1 = arith.addi %0, %arg1 : i32
    %c0_i32 = arith.constant 0 : i32
    %c0_i32_0 = arith.constant 0 : i32
    return %1, %c0_i32 : i32, i32
  }
  func.func @transform_2(%arg0: i32, %arg1: i32) -> (i32, i32) {
    %c1_i32 = arith.constant 1 : i32
    %0 = arith.muli %arg0, %c1_i32 : i32
    %1 = arith.addi %0, %arg1 : i32
    %c0_i32 = arith.constant 0 : i32
    %c0_i32_0 = arith.constant 0 : i32
    return %1, %c0_i32 : i32, i32
  }
  func.func @transform_3(%arg0: i32, %arg1: i32) -> (i32, i32) {
    %c0_i32 = arith.constant 0 : i32
    %c0_i32_0 = arith.constant 0 : i32
    return %arg0, %c0_i32 : i32, i32
  }
}

</mosaic_0001>

<bundles_post_ra>
// kernel: tpu_custom_call.1
= control target key start
LH: loop header
LB: loop body
LE: loop exit
PB: predicated region body
PF: predicated region fallthrough
CT: control target
= control target key end

     0   :  { %8 = vsyncpa [#allocation4], 0  ;;  %s336_s0 = inlined_call_operand.vmem [shape: f32[16,32], index: 0, kind: input, shape index: {}]   ;;  %s337_s1 = inlined_call_operand.hbm [shape: f32[16,32], index: 1, kind: input, shape index: {}]   ;;  %s338_s2 = inlined_call_operand.vmem [shape: f32[16,1], index: 2, kind: input, shape index: {}]   ;;  %s339_s3 = inlined_call_operand.hbm [shape: f32[8,128], index: 3, kind: output, shape index: {}]  }
   0x1   :  { %9 = vsyncpa [#allocation5], 0  ;;  %s263_s12 = smov [#allocation3]   ;;  %s215_s16 = scalar_lea.hbm %s337_s1, 256 }
   0x2   :  { %s29_s13 = sshll.u32 %s263_s12, 4  ;;  %p216_p0 = scmp.ne.s32.totalorder %s337_s1, %s215_s16  ;;  %s30_s13 = int_to_ptr.vmem [resolvable:$true] %s29_s13 }
   0x3   :  { %p219_p1 = scmp.lt.u32.totalorder %s215_s16, %s337_s1 }
   0x5   :  { %p221_p2 = pnand %p219_p1, %p216_p0 }
   0x7   :  { %224 = shalt.err (!%p221_p2)
}
   0x8   :  { %s225_s21 = scalar_lea.vmem %s30_s13, 256  ;;  %p230_p4 = scmp.lt.s32.totalorder %s30_s13, %s30_s13 }
   0x9   :  { %p226_p3 = scmp.ne.s32.totalorder %s30_s13, %s225_s21  ;;  %p231_p5 = scmp.lt.s32.totalorder %s225_s21, %s225_s21 }
   0xb   :  { %p232_p6 = por %p231_p5, %p230_p4 }
   0xd   :  { %p233_p7 = pnand %p232_p6, %p226_p3 }
   0xf   :  { %236 = shalt.err (!%p233_p7)
}
  0x10   :  { %s264_s22 = smov 128   ;;  %s265_s23 = smov 8  }
  0x11   :  { %35 = dma.hbm_to_vmem [thread:$0]  %s337_s1, 256, %s30_s13, [#allocation4], %s264_s22, %s264_s22, %s265_s23  }
  0x12   :  { %259 = dma.done.wait [#allocation4], 256  }
  0x13   :  { %260 = vsyncadd [#allocation4], 4294967040  ;;  %v86_v0 = vld [vmem:[%s336_s0] sm:$0xff]  ;;  %vm94_vm0 = vcmask 261120   ;;  %v88_v1 = vld [vmem:[#allocation3] sm:$0xff]  ;;  %vm83_vm1 = vcmask 7168  }
  0x14   :  { %v87_v2 = vld [vmem:[%s336_s0 + $0x8] sm:$0xff]  ;;  %v101_v3 = vmul.f32 %v86_v0, %v86_v0  ;;  %v109_v4 = vmul.f32 %v88_v1, %v88_v1  ;;  %v89_v6 = vld [vmem:[#allocation3 + $0x8] sm:$0xff]  ;;  %v92_v12 = vmul.f32 %v88_v1, %v86_v0  ;;  %v266_v16 = vmov 0.0   ;;  %v90_v35 = vld [vmem:[%s338_s2] sm:$0xff] }
  0x15   :  { %v102_v5 = vmul.f32 %v87_v2, %v87_v2  ;;  %v110_v7 = vmul.f32 %v89_v6, %v89_v6  ;;  %v93_v13 = vmul.f32 %v89_v6, %v87_v2  ;;  %84 = vst.msk [vmem:[#allocation2] sm:$0xff] %vm83_vm1, %v266_v16  ;;  %85 = vst.msk [vmem:[#allocation2 + $0x8] sm:$0xff] %vm83_vm1, %v266_v16  ;;  %v139_v36 = vsub.f32 1.0, %v90_v35  ;;  %v91_v42 = vld [vmem:[%s338_s2 + $0x8] sm:$0xff]  ;;  %s267_s2 = smov [#allocation6]  }
  0x16   :  { %v103_v8 = vsel %vm94_vm0, %v101_v3, 0.0  ;;  %v111_v9 = vsel %vm94_vm0, %v109_v4, 0.0  ;;  %v95_v14 = vsel %vm94_vm0, %v92_v12, 0.0  ;;  %v140_v44 = vsub.f32 1.0, %v91_v42  ;;  %s179_s5 = sshll.u32 %s267_s2, 4  ;;  %s180_s5 = int_to_ptr.vmem [resolvable:$true] %s179_s5 }
  0x17   :  { %104 = vadd.xlane.f32.xlu0 %v103_v8  ;;  %112 = vadd.xlane.f32.xlu1 %v111_v9  ;;  %v106_v10 = vsel %vm94_vm0, %v102_v5, 0.0  ;;  %v114_v11 = vsel %vm94_vm0, %v110_v7, 0.0  ;;  %v98_v15 = vsel %vm94_vm0, %v93_v13, 0.0  ;;  %s237_s7 = scalar_lea.vmem %s180_s5, 128  ;;  %p242_p9 = scmp.lt.s32.totalorder %s180_s5, %s180_s5 }
  0x18   :  { %p238_p8 = scmp.ne.s32.totalorder %s180_s5, %s237_s7  ;;  %p243_p10 = scmp.lt.s32.totalorder %s237_s7, %s237_s7 }
  0x1a   :  { %p244_p11 = por %p243_p10, %p242_p9 }
  0x1b   :  { %107 = vadd.xlane.f32.xlu0 %v106_v10  ;;  %115 = vadd.xlane.f32.xlu1 %v114_v11 }
  0x1c   :  { %v147_v50 = vld [vmem:[#allocation2] sm:$0xff]  ;;  %v148_v56 = vld [vmem:[#allocation2 + $0x8] sm:$0xff]  ;;  %p245_p12 = pnand %p244_p11, %p238_p8 }
  0x1f   :  { %96 = vadd.xlane.f32.xlu0 %v95_v14  ;;  %99 = vadd.xlane.f32.xlu1 %v98_v15 }
  0xa4   :  { %v105_v17 = vpop.xlane.xlu0 %104  ;;  %v113_v18 = vpop.xlane.xlu1 %112 }
  0xa5   :  { %v117_v19 = vmax.f32 %v105_v17, 1e-16  ;;  %v121_v20 = vmax.f32 %v113_v18, 1e-16 }
  0xa7   :  { %207 = vrsqrt.f32 %v117_v19 }
  0xa8   :  { %209 = vrsqrt.f32 %v121_v20  ;;  %v108_v21 = vpop.xlane.xlu0 %107  ;;  %v116_v22 = vpop.xlane.xlu1 %115 }
  0xa9   :  { %v118_v23 = vmax.f32 %v108_v21, 1e-16  ;;  %v122_v24 = vmax.f32 %v116_v22, 1e-16 }
  0xab   :  { %211 = vrsqrt.f32 %v118_v23 }
  0xac   :  { %213 = vrsqrt.f32 %v122_v24  ;;  %v97_v25 = vpop.xlane.xlu0 %96  ;;  %v100_v29 = vpop.xlane.xlu1 %99 }
  0xb1   :  { %v208_v26 = vpop.eup %207 }
  0xb2   :  { %v210_v27 = vpop.eup %209  ;;  %v125_v28 = vmul.f32 %v208_v26, %v97_v25 }
  0xb4   :  { %v127_v30 = vmul.f32 %v210_v27, %v125_v28 }
  0xb5   :  { %v212_v31 = vpop.eup %211 }
  0xb6   :  { %v214_v32 = vpop.eup %213  ;;  %v129_v33 = vsub.f32 1.0, %v127_v30  ;;  %v126_v34 = vmul.f32 %v212_v31, %v100_v29 }
  0xb8   :  { %v131_v37 = vsub.f32 400.0, %v129_v33  ;;  %v128_v38 = vmul.f32 %v214_v32, %v126_v34  ;;  %v135_v40 = vmul.f32 %v129_v33, %v90_v35 }
  0xba   :  { %v133_v39 = vmax.f32 %v131_v37, 0.0  ;;  %v130_v41 = vsub.f32 1.0, %v128_v38  ;;  %v137_v46 = vmul.f32 %v135_v40, %v129_v33 }
  0xbc   :  { %v141_v43 = vmul.f32 %v139_v36, %v133_v39  ;;  %v132_v45 = vsub.f32 400.0, %v130_v41  ;;  %v136_v49 = vmul.f32 %v130_v41, %v91_v42 }
  0xbe   :  { %v143_v47 = vmul.f32 %v141_v43, %v133_v39  ;;  %v134_v48 = vmax.f32 %v132_v45, 0.0  ;;  %v138_v54 = vmul.f32 %v136_v49, %v130_v41 }
  0xc0   :  { %v145_v51 = vadd.f32 %v143_v47, %v137_v46  ;;  %v142_v52 = vmul.f32 %v140_v44, %v134_v48 }
  0xc2   :  { %v149_v53 = vadd.f32 %v147_v50, %v145_v51  ;;  %v144_v55 = vmul.f32 %v142_v52, %v134_v48 }
  0xc4   :  { %152 = vst.msk [vmem:[#allocation2] sm:$0xff] %vm83_vm1, %v149_v53  ;;  %v146_v57 = vadd.f32 %v144_v55, %v138_v54 }
  0xc6   :  { %v150_v58 = vadd.f32 %v148_v56, %v146_v57 }
  0xc8   :  { %153 = vst.msk [vmem:[#allocation2 + $0x8] sm:$0xff] %vm83_vm1, %v150_v58 }
  0xcb   :  { %v157_v59 = vld [vmem:[#allocation2] sm:$0xff] }
  0xcc   :  { %v159_v61 = vsel %vm83_vm1, %v157_v59, 0.0 }
  0xcf   :  { %v158_v60 = vld [vmem:[#allocation2 + $0x8] sm:$0xff] }
  0xd0   :  { %v160_v62 = vsel %vm83_vm1, %v158_v60, 0.0 }
  0xd1   :  { %v161_v63 = vadd.f32 %v160_v62, %v159_v61 }
  0xd3   :  { %162 = vadd.xlane.f32.xlu0 %v161_v63 }
 0x160   :  { %v163_v0 = vpop.xlane.xlu0 %162 }
 0x161   :  { %v164_v1 = vrot.slane %v163_v0, 4 }
 0x163   :  { %v165_v2 = vadd.f32 %v164_v1, %v163_v0 }
 0x165   :  { %v166_v3 = vrot.slane %v165_v2, 2 }
 0x167   :  { %v167_v4 = vadd.f32 %v166_v3, %v165_v2 }
 0x169   :  { %v168_v5 = vrot.slane %v167_v4, 1 }
 0x16b   :  { %v169_v6 = vadd.f32 %v168_v5, %v167_v4 }
 0x16d   :  { %200 = vpush %v169_v6 }
 0x19e   :  { %s201_s6 = spop %200 }
 0x19f   :  { %v171_v7 = vstv %s201_s6 }
 0x1a0   :  { %172 = vst [vmem:[#allocation6] sm:$0xff] %v171_v7 }
 0x1a1   :  { %248 = shalt.err (!%p245_p12)
}
 0x1a2   :  { %s249_s10 = scalar_lea.hbm %s339_s3, 128 }
 0x1a3   :  { %p250_p13 = scmp.ne.s32.totalorder %s339_s3, %s249_s10  ;;  %p253_p0 = scmp.lt.u32.totalorder %s249_s10, %s339_s3 }
 0x1a5   :  { %p255_p1 = pnand %p253_p0, %p250_p13 }
 0x1a7   :  { %258 = shalt.err (!%p255_p1)
}
 0x1a8   :  { %182 = dma.vmem_to_hbm [thread:$0]  %s180_s5, 128, %s339_s3, [#allocation5]  }
 0x1a9   :  { %261 = dma.done.wait [#allocation5], 128  }
 0x1aa   :  { %262 = vsyncadd [#allocation5], 4294967168 }
 0x1ab   :  { %186 = vsyncpa [#allocation4], 1 }
 0x1ac   :  { %187 = vsyncpa [#allocation5], 1 }

</bundles_post_ra>
